<compile_context>
chip_gen: v5e
topology: v5e:2x2
jax: 0.10.0
libtpu: 0.0.40
codegen_flags: <defaults>
</compile_context>

<pallas_src>
import functools

import jax
import jax.numpy as jnp
from jax.experimental import pallas as pl
from jax.experimental.pallas import tpu as pltpu

LANE = 128
SUBLANE = 8


def _round_up(n, m):
    return ((n + m - 1) // m) * m


# ---------------------------------------------------------------------------
# Kernel bodies
# ---------------------------------------------------------------------------
def _mlp_block(x_ref, w1_ref, b1_ref, w2_ref, b2_ref):
    # layer 1: bf16 operands on the MXU, f32 accumulation
    h = jnp.dot(x_ref[...], w1_ref[...], preferred_element_type=jnp.float32)
    h = jnp.maximum(h + b1_ref[...], 0.0)                 # f32 bias + ReLU (VPU)
    # layer 2: cast activations back to bf16 for the MXU operand path
    p = jnp.dot(h.astype(w2_ref.dtype), w2_ref[...],
                preferred_element_type=jnp.float32)
    return p + b2_ref[...]


def _train_kernel(x_ref, w1_ref, b1_ref, w2_ref, b2_ref, y_ref,
                  preds_ref, lsum_ref):
    p = _mlp_block(x_ref, w1_ref, b1_ref, w2_ref, b2_ref)
    preds_ref[...] = p.astype(preds_ref.dtype)
    # squared-error partial sum reduced over batch rows only -> lane-dense
    # (1, 128) row per grid step.  Padded output lanes contribute exactly 0
    # (zero weight cols, zero bias, zero-padded labels), so the wrapper just
    # sums everything and divides by the *logical* element count.
    d = p - y_ref[...]
    lsum_ref[...] = jnp.sum(d * d, axis=0, keepdims=True)


def _eval_kernel(x_ref, w1_ref, b1_ref, w2_ref, b2_ref, preds_ref):
    preds_ref[...] = _mlp_block(
        x_ref, w1_ref, b1_ref, w2_ref, b2_ref).astype(preds_ref.dtype)


# ---------------------------------------------------------------------------
# Parameter padding (done ONCE per set of weights, not per step)
# ---------------------------------------------------------------------------
def pad_params(params):
    """Zero-pad weights/biases to lane-dense (128-multiple) shapes.

    Zero padding is exact: padded input columns hit zero W1 rows, padded hidden
    units get zero weights + zero bias (ReLU(0)=0), padded output columns get
    zero weights + zero bias, so logical outputs are unchanged and padded
    outputs are exactly 0.
    """
    w1, b1, w2, b2 = params
    in_f, hid = w1.shape
    out_f = w2.shape[1]
    in_p, hid_p, out_p = (_round_up(d, LANE) for d in (in_f, hid, out_f))
    w1p = jnp.pad(w1, ((0, in_p - in_f), (0, hid_p - hid))).astype(jnp.bfloat16)
    b1p = jnp.pad(b1, ((0, 0), (0, hid_p - hid))).astype(jnp.float32)
    w2p = jnp.pad(w2, ((0, hid_p - hid), (0, out_p - out_f))).astype(jnp.bfloat16)
    b2p = jnp.pad(b2, ((0, 0), (0, out_p - out_f))).astype(jnp.float32)
    return (w1p, b1p, w2p, b2p), (in_f, out_f)


# ---------------------------------------------------------------------------
# Trainer.forward: training -> (loss, preds) ; eval -> preds
# ---------------------------------------------------------------------------
@functools.partial(jax.jit, static_argnames=("dims", "training", "block_b"))
def trainer_forward(padded_params, dims, inputs, labels=None, training=True,
                    block_b=None):
    w1p, b1p, w2p, b2p = padded_params
    in_f, out_f = dims
    in_p, hid_p = w1p.shape
    out_p = w2p.shape[1]

    B = inputs.shape[0]
    if block_b is None:
        block_b = min(_round_up(B, SUBLANE), 128)
    assert B % block_b == 0, "batch must be a multiple of the batch block size"
    n_chunks = B // block_b

    # lane-dense bf16 operand for the MXU
    xp = jnp.pad(inputs, ((0, 0), (0, in_p - in_f))).astype(jnp.bfloat16)

    weight_specs = [
        pl.BlockSpec((in_p, hid_p), lambda s: (0, 0)),     # w1: VMEM-resident
        pl.BlockSpec((1, hid_p), lambda s: (0, 0)),        # b1: VMEM-resident
        pl.BlockSpec((hid_p, out_p), lambda s: (0, 0)),    # w2: VMEM-resident
        pl.BlockSpec((1, out_p), lambda s: (0, 0)),        # b2: VMEM-resident
    ]
    x_spec = pl.BlockSpec((block_b, in_p), lambda s: (s, 0))
    preds_spec = pl.BlockSpec((block_b, out_p), lambda s: (s, 0))
    cparams = pltpu.CompilerParams(
        dimension_semantics=("parallel",),     # distinct output blocks / step
        vmem_limit_bytes=32 * 1024 * 1024,     # explicit budget (v7x-safe)
    )

    if not training:
        preds_pad = pl.pallas_call(
            _eval_kernel,
            out_shape=jax.ShapeDtypeStruct((B, out_p), jnp.float32),
            grid=(n_chunks,),
            in_specs=[x_spec] + weight_specs,
            out_specs=preds_spec,
            compiler_params=cparams,
        )(xp, w1p, b1p, w2p, b2p)
        return preds_pad[:, :out_f]

    # labels stay f32 for the f32 MSE path; zero-padded lanes stay exactly 0
    yp = jnp.pad(labels, ((0, 0), (0, out_p - out_f))).astype(jnp.float32)

    preds_pad, lsum = pl.pallas_call(
        _train_kernel,
        out_shape=(jax.ShapeDtypeStruct((B, out_p), jnp.float32),
                   jax.ShapeDtypeStruct((n_chunks, out_p), jnp.float32)),
        grid=(n_chunks,),
        in_specs=[x_spec] + weight_specs + [
            pl.BlockSpec((block_b, out_p), lambda s: (s, 0)),  # labels / chunk
        ],
        out_specs=(
            preds_spec,
            pl.BlockSpec((1, out_p), lambda s: (s, 0)),        # loss partials
        ),
        compiler_params=cparams,
    )(xp, w1p, b1p, w2p, b2p, yp)

    preds = preds_pad[:, :out_f]
    loss = jnp.sum(lsum) / jnp.float32(B * out_f)
    return loss, preds


# ---------------------------------------------------------------------------
# Deterministic parameter construction
# ---------------------------------------------------------------------------
def make_params(key, in_f=32, hid=64, out_f=16):
    k1, k2, k3, k4 = jax.random.split(key, 4)
    w1 = jax.random.normal(k1, (in_f, hid), jnp.float32) * 0.1
    b1 = jax.random.normal(k2, (1, hid), jnp.float32) * 0.01
    w2 = jax.random.normal(k3, (hid, out_f), jnp.float32) * 0.1
    b2 = jax.random.normal(k4, (1, out_f), jnp.float32) * 0.01
    return (w1, b1, w2, b2)


if __name__ == "__main__":
    key = jax.random.PRNGKey(0)
    kp, kx, ky = jax.random.split(key, 3)

    batch, in_f, hid, out_f = 8, 32, 64, 16
    params = make_params(kp, in_f, hid, out_f)
    x = jax.random.normal(kx, (batch, in_f), jnp.float32)
    y = jax.random.normal(ky, (batch, out_f), jnp.float32)

    padded_params, dims = pad_params(params)   # pad + bf16-cast weights once

    # training path: (loss, preds)
    loss, preds = trainer_forward(padded_params, dims, x, y, training=True)
    loss, preds = jax.block_until_ready((loss, preds))

    # eval path: preds only (no labels DMA, no MSE work)
    preds_eval = jax.block_until_ready(
        trainer_forward(padded_params, dims, x, labels=None, training=False))

    # reference with the same bf16 operand rounding (f32 accumulation)
    w1, b1, w2, b2 = params
    xb, w1b, w2b = (t.astype(jnp.bfloat16) for t in (x, w1, w2))
    h_ref = jnp.maximum(
        jnp.dot(xb, w1b, preferred_element_type=jnp.float32) + b1, 0.0)
    p_ref = jnp.dot(h_ref.astype(jnp.bfloat16), w2b,
                    preferred_element_type=jnp.float32) + b2
    l_ref = jnp.mean((p_ref - y) ** 2)

    assert preds.shape == (batch, out_f)
    assert jnp.allclose(preds, p_ref, atol=1e-4, rtol=1e-4), "preds mismatch"
    assert jnp.allclose(preds_eval, p_ref, atol=1e-4, rtol=1e-4), "eval mismatch"
    assert jnp.allclose(loss, l_ref, atol=1e-4, rtol=1e-4), "loss mismatch"

    # coarse sanity vs the original module's pure-f32 math
    pf = jnp.maximum(x @ w1 + b1, 0.0) @ w2 + b2
    assert jnp.allclose(preds, pf, atol=5e-2), "f32 sanity mismatch (preds)"
    assert jnp.allclose(loss, jnp.mean((pf - y) ** 2), atol=5e-2), "f32 sanity (loss)"

    print("KERNEL_OK")
</pallas_src>

<mosaic_0001>
module attributes {stable_mosaic.version = 11 : i64} {
  func.func @_train_kernel(%arg0: i32, %arg1: memref<8x128xbf16, #tpu.memory_space<vmem>>, %arg2: memref<128x128xbf16, #tpu.memory_space<vmem>>, %arg3: memref<1x128xf32, #tpu.memory_space<vmem>>, %arg4: memref<128x128xbf16, #tpu.memory_space<vmem>>, %arg5: memref<1x128xf32, #tpu.memory_space<vmem>>, %arg6: memref<8x128xf32, #tpu.memory_space<vmem>>, %arg7: memref<8x128xf32, #tpu.memory_space<vmem>>, %arg8: memref<1x128xf32, #tpu.memory_space<vmem>>) attributes {dimension_semantics = [#tpu.dimension_semantics<parallel>], iteration_bounds = array<i64: 1>, scalar_prefetch = 0 : i64, scratch_operands = 0 : i64, tpu.core_type = #tpu.core_type<tc>, window_params = [{transform_indices = @transform_0, window_bounds = array<i64: 8, 128>}, {pipeline_mode = #tpu.pipeline_mode<synchronous>, transform_indices = @transform_1, window_bounds = array<i64: 128, 128>}, {pipeline_mode = #tpu.pipeline_mode<synchronous>, transform_indices = @transform_2, window_bounds = array<i64: 1, 128>}, {pipeline_mode = #tpu.pipeline_mode<synchronous>, transform_indices = @transform_3, window_bounds = array<i64: 128, 128>}, {pipeline_mode = #tpu.pipeline_mode<synchronous>, transform_indices = @transform_4, window_bounds = array<i64: 1, 128>}, {transform_indices = @transform_5, window_bounds = array<i64: 8, 128>}, {transform_indices = @transform_6, window_bounds = array<i64: 8, 128>}, {transform_indices = @transform_7, window_bounds = array<i64: 1, 128>}]} {
    %c0 = arith.constant 0 : index
    %c0_0 = arith.constant 0 : index
    %0 = vector.load %arg1[%c0, %c0_0] : memref<8x128xbf16, #tpu.memory_space<vmem>>, vector<8x128xbf16>
    %c0_1 = arith.constant 0 : index
    %c0_2 = arith.constant 0 : index
    %1 = vector.load %arg2[%c0_1, %c0_2] : memref<128x128xbf16, #tpu.memory_space<vmem>>, vector<128x128xbf16>
    %cst = arith.constant dense<0.000000e+00> : vector<8x128xf32>
    %2 = tpu.matmul %0, %1, %cst {dimension_numbers = #tpu.dot_dimension_numbers<[1], [0], [0], [1], [0, 0, 1, 1], [], []>} : vector<8x128xbf16>, vector<128x128xbf16>, vector<8x128xf32> -> vector<8x128xf32>
    %c0_3 = arith.constant 0 : index
    %c0_4 = arith.constant 0 : index
    %3 = vector.load %arg3[%c0_3, %c0_4] : memref<1x128xf32, #tpu.memory_space<vmem>>, vector<1x128xf32>
    %4 = vector.broadcast %3 : vector<1x128xf32> to vector<8x128xf32>
    %5 = arith.addf %2, %4 : vector<8x128xf32>
    %cst_5 = arith.constant 0.000000e+00 : f32
    %6 = vector.broadcast %cst_5 : f32 to vector<8x128xf32>
    %7 = arith.maximumf %5, %6 : vector<8x128xf32>
    %8 = arith.truncf %7 : vector<8x128xf32> to vector<8x128xbf16>
    %c0_6 = arith.constant 0 : index
    %c0_7 = arith.constant 0 : index
    %9 = vector.load %arg4[%c0_6, %c0_7] : memref<128x128xbf16, #tpu.memory_space<vmem>>, vector<128x128xbf16>
    %cst_8 = arith.constant dense<0.000000e+00> : vector<8x128xf32>
    %10 = tpu.matmul %8, %9, %cst_8 {dimension_numbers = #tpu.dot_dimension_numbers<[1], [0], [0], [1], [0, 0, 1, 1], [], []>} : vector<8x128xbf16>, vector<128x128xbf16>, vector<8x128xf32> -> vector<8x128xf32>
    %c0_9 = arith.constant 0 : index
    %c0_10 = arith.constant 0 : index
    %11 = vector.load %arg5[%c0_9, %c0_10] : memref<1x128xf32, #tpu.memory_space<vmem>>, vector<1x128xf32>
    %12 = vector.broadcast %11 : vector<1x128xf32> to vector<8x128xf32>
    %13 = arith.addf %10, %12 : vector<8x128xf32>
    %c0_11 = arith.constant 0 : index
    %c0_12 = arith.constant 0 : index
    %14 = vector.load %arg7[%c0_11, %c0_12] : memref<8x128xf32, #tpu.memory_space<vmem>>, vector<8x128xf32>
    tpu.vector_store %arg7[%c0_11, %c0_12], %13 {strides = array<i32>} : memref<8x128xf32, #tpu.memory_space<vmem>>, vector<8x128xf32>,
    %c0_13 = arith.constant 0 : index
    %c0_14 = arith.constant 0 : index
    %15 = vector.load %arg6[%c0_13, %c0_14] : memref<8x128xf32, #tpu.memory_space<vmem>>, vector<8x128xf32>
    %16 = arith.subf %13, %15 : vector<8x128xf32>
    %17 = arith.mulf %16, %16 : vector<8x128xf32>
    %cst_15 = arith.constant dense<0.000000e+00> : vector<128xf32>
    %18 = vector.multi_reduction <add>, %17, %cst_15 [0] : vector<8x128xf32> to vector<128xf32>
    %19 = vector.shape_cast %18 : vector<128xf32> to vector<1x128xf32>
    %c0_16 = arith.constant 0 : index
    %c0_17 = arith.constant 0 : index
    %20 = vector.load %arg8[%c0_16, %c0_17] : memref<1x128xf32, #tpu.memory_space<vmem>>, vector<1x128xf32>
    tpu.vector_store %arg8[%c0_16, %c0_17], %19 {strides = array<i32>} : memref<1x128xf32, #tpu.memory_space<vmem>>, vector<1x128xf32>,
    return
  }
  func.func @transform_0(%arg0: i32) -> (i32, i32) {
    %c0_i32 = arith.constant 0 : i32
    %c0_i32_0 = arith.constant 0 : i32
    return %arg0, %c0_i32 : i32, i32
  }
  func.func @transform_1(%arg0: i32) -> (i32, i32) {
    %c0_i32 = arith.constant 0 : i32
    %c0_i32_0 = arith.constant 0 : i32
    %c0_i32_1 = arith.constant 0 : i32
    return %c0_i32, %c0_i32_0 : i32, i32
  }
  func.func @transform_2(%arg0: i32) -> (i32, i32) {
    %c0_i32 = arith.constant 0 : i32
    %c0_i32_0 = arith.constant 0 : i32
    %c0_i32_1 = arith.constant 0 : i32
    return %c0_i32, %c0_i32_0 : i32, i32
  }
  func.func @transform_3(%arg0: i32) -> (i32, i32) {
    %c0_i32 = arith.constant 0 : i32
    %c0_i32_0 = arith.constant 0 : i32
    %c0_i32_1 = arith.constant 0 : i32
    return %c0_i32, %c0_i32_0 : i32, i32
  }
  func.func @transform_4(%arg0: i32) -> (i32, i32) {
    %c0_i32 = arith.constant 0 : i32
    %c0_i32_0 = arith.constant 0 : i32
    %c0_i32_1 = arith.constant 0 : i32
    return %c0_i32, %c0_i32_0 : i32, i32
  }
  func.func @transform_5(%arg0: i32) -> (i32, i32) {
    %c0_i32 = arith.constant 0 : i32
    %c0_i32_0 = arith.constant 0 : i32
    return %arg0, %c0_i32 : i32, i32
  }
  func.func @transform_6(%arg0: i32) -> (i32, i32) {
    %c0_i32 = arith.constant 0 : i32
    %c0_i32_0 = arith.constant 0 : i32
    return %arg0, %c0_i32 : i32, i32
  }
  func.func @transform_7(%arg0: i32) -> (i32, i32) {
    %c0_i32 = arith.constant 0 : i32
    %c0_i32_0 = arith.constant 0 : i32
    return %arg0, %c0_i32 : i32, i32
  }
}

</mosaic_0001>

<bundles_post_ra>
// kernel: trainer_forward.1
= control target key start
LH: loop header
LB: loop body
LE: loop exit
PB: predicated region body
PF: predicated region fallthrough
CT: control target
= control target key end

     0   :  { %13 = vsyncpa [#allocation3], 0  ;;  %s490_s0 = inlined_call_operand.vmem [shape: bf16[8,128], index: 0, kind: input, shape index: {}]   ;;  %s491_s1 = inlined_call_operand.hbm [shape: bf16[128,128], index: 1, kind: input, shape index: {}]   ;;  %s492_s2 = inlined_call_operand.vmem [shape: f32[1,128], index: 2, kind: input, shape index: {}]   ;;  %s493_s3 = inlined_call_operand.hbm [shape: bf16[128,128], index: 3, kind: input, shape index: {}]   ;;  %s494_s4 = inlined_call_operand.vmem [shape: f32[1,128], index: 4, kind: input, shape index: {}]   ;;  %s495_s5 = inlined_call_operand.vmem [shape: f32[8,128], index: 5, kind: input, shape index: {}]   ;;  %s496_s6 = inlined_call_operand.hbm [shape: f32[8,128], index: 6, kind: output, shape index: {0}]   ;;  %s497_s7 = inlined_call_operand.vmem [shape: f32[1,128], index: 7, kind: output, shape index: {1}]  }
   0x1   :  { %14 = vsyncpa [#allocation6], 0 }
   0x2   :  { %15 = vsyncpa [#allocation4], 0  ;;  %s22_s26 = sshll.u32 %s491_s1, 4  ;;  %s421_s27 = smov [#allocation2]   ;;  %s23_s26 = int_to_ptr.hbm [resolvable:$true] %s22_s26 }
   0x3   :  { %s24_s28 = sshll.u32 %s421_s27, 4  ;;  %s37_s8 = sshll.u32 %s493_s3, 4  ;;  %s25_s28 = int_to_ptr.vmem [resolvable:$true] %s24_s28  ;;  %s38_s8 = int_to_ptr.hbm [resolvable:$true] %s37_s8 }
   0x4   :  { %s422_s9 = smov 64   ;;  %s423_s10 = smov 4  }
   0x5   :  { %30 = dma.hbm_to_vmem [thread:$0]  %s23_s26, 1024, %s25_s28, [#allocation3], %s422_s9, %s422_s9, %s423_s10  }
   0x6   :  { %s424_s11 = smov [#allocation5]  }
   0x7   :  { %s39_s12 = sshll.u32 %s424_s11, 4  ;;  %s40_s12 = int_to_ptr.vmem [resolvable:$true] %s39_s12 }
   0x8   :  { %45 = dma.hbm_to_vmem [thread:$0]  %s38_s8, 1024, %s40_s12, [#allocation6], %s422_s9, %s422_s9, %s423_s10  }
   0x9   :  { %415 = dma.done.wait [#allocation3], 1024  }
   0xa   :  { %416 = vsyncadd [#allocation3], 4294966272 }
   0xb   :  { %417 = dma.done.wait [#allocation6], 1024  }
   0xc   :  { %418 = vsyncadd [#allocation6], 4294966272  ;;  %v327_v0 = vld [vmem:[#allocation2 + $0x38] sm:$0xff]  ;;  %v326_v1 = vld [vmem:[#allocation2 + $0x30] sm:$0xff]  ;;  %s241_s20 = sshll.u32 %s496_s6, 4  ;;  %s242_s20 = int_to_ptr.hbm [resolvable:$true] %s241_s20 }
   0xd   :  { %127 = vmatpush.bf16.msra.mxu0 %v327_v0  ;;  %v335_v2 = vld [vmem:[#allocation5 + $0x38] sm:$0xff]  ;;  %v334_v3 = vld [vmem:[#allocation5 + $0x30] sm:$0xff]  ;;  %v325_v4 = vld [vmem:[#allocation2 + $0x28] sm:$0xff] }
   0xe   :  { %210 = vmatpush.bf16.msra.mxu1 %v335_v2  ;;  %v333_v5 = vld [vmem:[#allocation5 + $0x28] sm:$0xff]  ;;  %v324_v6 = vld [vmem:[#allocation2 + $0x20] sm:$0xff]  ;;  %v323_v8 = vld [vmem:[#allocation2 + $0x18] sm:$0xff] }
   0xf   :  { %v332_v7 = vld [vmem:[#allocation5 + $0x20] sm:$0xff]  ;;  %v331_v9 = vld [vmem:[#allocation5 + $0x18] sm:$0xff]  ;;  %v322_v10 = vld [vmem:[#allocation2 + $0x10] sm:$0xff] }
  0x10   :  { %v330_v11 = vld [vmem:[#allocation5 + $0x10] sm:$0xff]  ;;  %v321_v12 = vld [vmem:[#allocation2 + $0x8] sm:$0xff]  ;;  %v320_v13 = vld [vmem:[#allocation2] sm:$0xff] }
  0x11   :  { %128 = vmatpush.bf16.msra.mxu0 %v326_v1  ;;  %v58_v14 = vld [vmem:[%s490_s0] sm:$0xf]  ;;  %v329_v15 = vld [vmem:[#allocation5 + $0x8] sm:$0xff]  ;;  %s425_s0 = smov [#allocation7]  }
  0x12   :  { %211 = vmatpush.bf16.msra.mxu1 %v334_v3  ;;  %v328_v16 = vld [vmem:[#allocation5] sm:$0xff]  ;;  %s239_s17 = sshll.u32 %s425_s0, 4  ;;  %s240_s17 = int_to_ptr.vmem [resolvable:$true] %s239_s17 }
  0x13   :  { %v341_v17 = vld [vmem:[%s492_s2] ss:$0 sm:$0xff] }
  0x14   :  { %v342_v23 = vld [vmem:[%s494_s4] ss:$0 sm:$0xff] }
  0x15   :  { %129 = vmatpush.bf16.msra.mxu0 %v325_v4  ;;  %v224_v25 = vld [vmem:[%s495_s5] sm:$0xff] }
  0x16   :  { %212 = vmatpush.bf16.msra.mxu1 %v333_v5 }
  0x19   :  { %130 = vmatpush.bf16.msra.mxu0 %v324_v6 }
  0x1a   :  { %213 = vmatpush.bf16.msra.mxu1 %v332_v7 }
  0x1d   :  { %131 = vmatpush.bf16.msra.mxu0 %v323_v8 }
  0x1e   :  { %214 = vmatpush.bf16.msra.mxu1 %v331_v9 }
  0x21   :  { %132 = vmatpush.bf16.msra.mxu0 %v322_v10 }
  0x22   :  { %215 = vmatpush.bf16.msra.mxu1 %v330_v11 }
  0x25   :  { %133 = vmatpush.bf16.msra.mxu0 %v321_v12 }
  0x26   :  { %216 = vmatpush.bf16.msra.mxu1 %v329_v15 }
  0x29   :  { %134 = vmatpush.bf16.msra.mxu0 %v320_v13 }
  0x2a   :  { %217 = vmatpush.bf16.msra.mxu1 %v328_v16 }
  0x2c   :  { %135 = vmatmul.bf16.vlgmr.msra.gmra.mxu0 %v58_v14 }
  0xa9   :  { %v136_v18 = vpop.f32.mrf.mxu0 }
  0xaa   :  { %v137_v19 = vadd.f32 %v341_v17, %v136_v18 }
  0xac   :  { %v140_v20 = vmax.f32 %v137_v19, 0.0 }
  0xae   :  { %v141_v21 = vpack.c.bf16 %v140_v20, %v140_v20 }
  0xb0   :  { %218 = vmatmul.bf16.vlgmr.msra.gmra.mxu1 %v141_v21 }
  0xb1   :  { %v138_v22 = vpop.f32.mrf.mxu0 }
 0x12d   :  { %v219_v24 = vpop.f32.mrf.mxu1 }
 0x12e   :  { %v220_v26 = vadd.f32 %v342_v23, %v219_v24 }
 0x130   :  { %223 = vst [vmem:[#allocation7] sm:$0xff] %v220_v26  ;;  %v225_v27 = vsub.f32 %v220_v26, %v224_v25 }
 0x131   :  { %244 = dma.vmem_to_hbm [thread:$0]  %s240_s17, 128, %s242_s20, [#allocation4]  }
 0x132   :  { %v226_v28 = vmul.f32 %v225_v27, %v225_v27 }
 0x134   :  { %v227_v29 = vrot.slane %v226_v28, 4 }
 0x135   :  { %v221_v30 = vpop.f32.mrf.mxu1 }
 0x136   :  { %v228_v31 = vadd.f32 %v227_v29, %v226_v28 }
 0x138   :  { %v229_v32 = vrot.slane %v228_v31, 2 }
 0x13a   :  { %v230_v33 = vadd.f32 %v229_v32, %v228_v31 }
 0x13c   :  { %v231_v34 = vrot.slane %v230_v33, 1 }
 0x13e   :  { %v232_v35 = vadd.f32 %v231_v34, %v230_v33 }
 0x140   :  { %233 = vst [vmem:[%s497_s7] sm:$0x1] %v232_v35 }
 0x141   :  { %419 = dma.done.wait [#allocation4], 128  }
 0x142   :  { %420 = vsyncadd [#allocation4], 4294967168 }
 0x143   :  { %253 = vsyncpa [#allocation3], 1 }
 0x144   :  { %254 = vsyncpa [#allocation6], 1 }
 0x145   :  { %255 = vsyncpa [#allocation4], 1 }

</bundles_post_ra>
